<compile_context>
chip_gen: v7x
topology: tpu7x:2x2x1
jax: 0.10.0
libtpu: 0.0.40
codegen_flags: <defaults>
</compile_context>

<pallas_src>
import jax
import jax.numpy as jnp
from jax.experimental import pallas as pl
from jax.experimental.pallas import tpu as pltpu

INPUT, OUTPUT, HIDDEN = 7, 6, 30
N_LAYERS = 5
LANE = 128            # lane-padded feature width for every layer (vreg lane dim)
SUBLANE = 8           # f32 sublane granularity
MAX_BATCH_TILE = 256  # rows per grid step for large batches


def _round_up(n, m):
    return ((n + m - 1) // m) * m


def dqn_mlp_kernel(x_ref, w_ref, b_ref, o_ref):
    """One batch tile of the 5-layer MLP (ReLU between layers, no softmax).

    x_ref: (TB, 128)      zero-padded activations for this batch tile
    w_ref: (5, 128, 128)  zero-padded weights, VMEM-resident across tiles
    b_ref: (5, 1, 128)    zero-padded biases
    o_ref: (TB, 128)      lane-dense logits (columns >= OUTPUT are padding)
    """
    h = x_ref[...]
    for l in range(N_LAYERS):
        h = jnp.dot(h, w_ref[l], preferred_element_type=jnp.float32) + b_ref[l]
        if l < N_LAYERS - 1:
            h = jnp.maximum(h, 0.0)
    o_ref[...] = h.astype(o_ref.dtype)


def pack_params(params):
    """Pack 5 (W, b) pairs into lane/sublane-padded operands (one DMA each)."""
    w_packed = jnp.zeros((N_LAYERS, LANE, LANE), jnp.float32)
    b_packed = jnp.zeros((N_LAYERS, 1, LANE), jnp.float32)
    for l, (w, b) in enumerate(params):
        fi, fo = w.shape
        w_packed = w_packed.at[l, :fi, :fo].set(w)
        b_packed = b_packed.at[l, 0, :fo].set(b.reshape(-1))
    return w_packed, b_packed


def dqn_forward(x, w_packed, b_packed):
    B = x.shape[0]
    tb = min(MAX_BATCH_TILE, _round_up(B, SUBLANE))
    b_pad = _round_up(B, tb)

    # Zero-pad batch to a tile multiple and features to 128 lanes (exact for linear+ReLU).
    x_pad = jnp.zeros((b_pad, LANE), jnp.float32).at[:B, :INPUT].set(x)

    logits_pad = pl.pallas_call(
        dqn_mlp_kernel,
        out_shape=jax.ShapeDtypeStruct((b_pad, LANE), jnp.float32),
        grid=(b_pad // tb,),
        in_specs=[
            pl.BlockSpec((tb, LANE), lambda i: (i, 0)),                 # activations: tiled over batch
            pl.BlockSpec((N_LAYERS, LANE, LANE), lambda i: (0, 0, 0)),  # weights: resident
            pl.BlockSpec((N_LAYERS, 1, LANE), lambda i: (0, 0, 0)),     # biases: resident
        ],
        out_specs=pl.BlockSpec((tb, LANE), lambda i: (i, 0)),
        compiler_params=pltpu.CompilerParams(
            dimension_semantics=("parallel",)),
    )(x_pad, w_packed, b_packed)

    # Softmax over dim=0 couples all batch rows, so it cannot be computed per batch
    # tile; apply it to the sliced (B, OUTPUT) logits here (cheap, XLA-fused), which
    # also keeps padded rows/columns out of the column sums.
    logits = logits_pad[:B, :OUTPUT]
    return jax.nn.softmax(logits, axis=0)


def init_params(key):
    # Deterministic init mimicking PyTorch Linear default: U(-1/sqrt(fan_in), 1/sqrt(fan_in))
    dims = [(INPUT, HIDDEN), (HIDDEN, HIDDEN), (HIDDEN, HIDDEN),
            (HIDDEN, HIDDEN), (HIDDEN, OUTPUT)]
    params = []
    for (fan_in, fan_out) in dims:
        key, kw, kb = jax.random.split(key, 3)
        bound = 1.0 / jnp.sqrt(fan_in)
        w = jax.random.uniform(kw, (fan_in, fan_out), jnp.float32, -bound, bound)
        b = jax.random.uniform(kb, (1, fan_out), jnp.float32, -bound, bound)
        params.append((w, b))
    return params


def reference_forward(x, params):
    h = x
    for i, (w, b) in enumerate(params):
        h = h @ w + b
        if i < len(params) - 1:
            h = jnp.maximum(h, 0.0)
    return jax.nn.softmax(h, axis=0)


if __name__ == "__main__":
    key = jax.random.PRNGKey(0)
    key, kx1, kx2 = jax.random.split(key, 3)
    params = init_params(key)
    w_packed, b_packed = pack_params(params)

    # Small-batch case matching the module spec (batch=2, 7 features).
    x_small = jax.random.normal(kx1, (2, INPUT), jnp.float32)
    out_small = jax.block_until_ready(dqn_forward(x_small, w_packed, b_packed))
    ref_small = reference_forward(x_small, params)
    assert out_small.shape == (2, OUTPUT)
    assert jnp.allclose(out_small, ref_small, atol=1e-5, rtol=1e-5)

    # Larger batch exercises the multi-tile grid path (padded rows excluded from softmax).
    x_big = jax.random.normal(kx2, (300, INPUT), jnp.float32)
    out_big = jax.block_until_ready(dqn_forward(x_big, w_packed, b_packed))
    ref_big = reference_forward(x_big, params)
    assert out_big.shape == (300, OUTPUT)
    assert jnp.allclose(out_big, ref_big, atol=1e-5, rtol=1e-5)

    print("KERNEL_OK")
</pallas_src>

<mosaic_0001>
module attributes {stable_mosaic.version = 11 : i64} {
  func.func @dqn_mlp_kernel(%arg0: i32, %arg1: memref<8x128xf32, #tpu.memory_space<vmem>>, %arg2: memref<5x128x128xf32, #tpu.memory_space<vmem>>, %arg3: memref<5x1x128xf32, #tpu.memory_space<vmem>>, %arg4: memref<8x128xf32, #tpu.memory_space<vmem>>) attributes {dimension_semantics = [#tpu.dimension_semantics<parallel>], iteration_bounds = array<i64: 1>, scalar_prefetch = 0 : i64, scratch_operands = 0 : i64, tpu.core_type = #tpu.core_type<tc>, window_params = [{transform_indices = @transform_0, window_bounds = array<i64: 8, 128>}, {pipeline_mode = #tpu.pipeline_mode<synchronous>, transform_indices = @transform_1, window_bounds = array<i64: 5, 128, 128>}, {pipeline_mode = #tpu.pipeline_mode<synchronous>, transform_indices = @transform_2, window_bounds = array<i64: 5, 1, 128>}, {transform_indices = @transform_3, window_bounds = array<i64: 8, 128>}]} {
    %c0 = arith.constant 0 : index
    %c0_0 = arith.constant 0 : index
    %0 = vector.load %arg1[%c0, %c0_0] : memref<8x128xf32, #tpu.memory_space<vmem>>, vector<8x128xf32>
    %c0_1 = arith.constant 0 : index
    %c0_2 = arith.constant 0 : index
    %c0_3 = arith.constant 0 : index
    %1 = vector.load %arg2[%c0_1, %c0_2, %c0_3] : memref<5x128x128xf32, #tpu.memory_space<vmem>>, vector<1x128x128xf32>
    %2 = vector.shape_cast %1 : vector<1x128x128xf32> to vector<128x128xf32>
    %cst = arith.constant dense<0.000000e+00> : vector<8x128xf32>
    %3 = tpu.matmul %0, %2, %cst {dimension_numbers = #tpu.dot_dimension_numbers<[1], [0], [0], [1], [0, 0, 1, 1], [], []>} : vector<8x128xf32>, vector<128x128xf32>, vector<8x128xf32> -> vector<8x128xf32>
    %c0_4 = arith.constant 0 : index
    %c0_5 = arith.constant 0 : index
    %c0_6 = arith.constant 0 : index
    %4 = vector.load %arg3[%c0_4, %c0_5, %c0_6] : memref<5x1x128xf32, #tpu.memory_space<vmem>>, vector<1x1x128xf32>
    %5 = vector.shape_cast %4 : vector<1x1x128xf32> to vector<1x128xf32>
    %6 = vector.broadcast %5 : vector<1x128xf32> to vector<8x128xf32>
    %7 = arith.addf %3, %6 : vector<8x128xf32>
    %cst_7 = arith.constant 0.000000e+00 : f32
    %8 = vector.broadcast %cst_7 : f32 to vector<8x128xf32>
    %9 = arith.maximumf %7, %8 : vector<8x128xf32>
    %c1 = arith.constant 1 : index
    %c0_8 = arith.constant 0 : index
    %c0_9 = arith.constant 0 : index
    %10 = vector.load %arg2[%c1, %c0_8, %c0_9] : memref<5x128x128xf32, #tpu.memory_space<vmem>>, vector<1x128x128xf32>
    %11 = vector.shape_cast %10 : vector<1x128x128xf32> to vector<128x128xf32>
    %cst_10 = arith.constant dense<0.000000e+00> : vector<8x128xf32>
    %12 = tpu.matmul %9, %11, %cst_10 {dimension_numbers = #tpu.dot_dimension_numbers<[1], [0], [0], [1], [0, 0, 1, 1], [], []>} : vector<8x128xf32>, vector<128x128xf32>, vector<8x128xf32> -> vector<8x128xf32>
    %c1_11 = arith.constant 1 : index
    %c0_12 = arith.constant 0 : index
    %c0_13 = arith.constant 0 : index
    %13 = vector.load %arg3[%c1_11, %c0_12, %c0_13] : memref<5x1x128xf32, #tpu.memory_space<vmem>>, vector<1x1x128xf32>
    %14 = vector.shape_cast %13 : vector<1x1x128xf32> to vector<1x128xf32>
    %15 = vector.broadcast %14 : vector<1x128xf32> to vector<8x128xf32>
    %16 = arith.addf %12, %15 : vector<8x128xf32>
    %cst_14 = arith.constant 0.000000e+00 : f32
    %17 = vector.broadcast %cst_14 : f32 to vector<8x128xf32>
    %18 = arith.maximumf %16, %17 : vector<8x128xf32>
    %c2 = arith.constant 2 : index
    %c0_15 = arith.constant 0 : index
    %c0_16 = arith.constant 0 : index
    %19 = vector.load %arg2[%c2, %c0_15, %c0_16] : memref<5x128x128xf32, #tpu.memory_space<vmem>>, vector<1x128x128xf32>
    %20 = vector.shape_cast %19 : vector<1x128x128xf32> to vector<128x128xf32>
    %cst_17 = arith.constant dense<0.000000e+00> : vector<8x128xf32>
    %21 = tpu.matmul %18, %20, %cst_17 {dimension_numbers = #tpu.dot_dimension_numbers<[1], [0], [0], [1], [0, 0, 1, 1], [], []>} : vector<8x128xf32>, vector<128x128xf32>, vector<8x128xf32> -> vector<8x128xf32>
    %c2_18 = arith.constant 2 : index
    %c0_19 = arith.constant 0 : index
    %c0_20 = arith.constant 0 : index
    %22 = vector.load %arg3[%c2_18, %c0_19, %c0_20] : memref<5x1x128xf32, #tpu.memory_space<vmem>>, vector<1x1x128xf32>
    %23 = vector.shape_cast %22 : vector<1x1x128xf32> to vector<1x128xf32>
    %24 = vector.broadcast %23 : vector<1x128xf32> to vector<8x128xf32>
    %25 = arith.addf %21, %24 : vector<8x128xf32>
    %cst_21 = arith.constant 0.000000e+00 : f32
    %26 = vector.broadcast %cst_21 : f32 to vector<8x128xf32>
    %27 = arith.maximumf %25, %26 : vector<8x128xf32>
    %c3 = arith.constant 3 : index
    %c0_22 = arith.constant 0 : index
    %c0_23 = arith.constant 0 : index
    %28 = vector.load %arg2[%c3, %c0_22, %c0_23] : memref<5x128x128xf32, #tpu.memory_space<vmem>>, vector<1x128x128xf32>
    %29 = vector.shape_cast %28 : vector<1x128x128xf32> to vector<128x128xf32>
    %cst_24 = arith.constant dense<0.000000e+00> : vector<8x128xf32>
    %30 = tpu.matmul %27, %29, %cst_24 {dimension_numbers = #tpu.dot_dimension_numbers<[1], [0], [0], [1], [0, 0, 1, 1], [], []>} : vector<8x128xf32>, vector<128x128xf32>, vector<8x128xf32> -> vector<8x128xf32>
    %c3_25 = arith.constant 3 : index
    %c0_26 = arith.constant 0 : index
    %c0_27 = arith.constant 0 : index
    %31 = vector.load %arg3[%c3_25, %c0_26, %c0_27] : memref<5x1x128xf32, #tpu.memory_space<vmem>>, vector<1x1x128xf32>
    %32 = vector.shape_cast %31 : vector<1x1x128xf32> to vector<1x128xf32>
    %33 = vector.broadcast %32 : vector<1x128xf32> to vector<8x128xf32>
    %34 = arith.addf %30, %33 : vector<8x128xf32>
    %cst_28 = arith.constant 0.000000e+00 : f32
    %35 = vector.broadcast %cst_28 : f32 to vector<8x128xf32>
    %36 = arith.maximumf %34, %35 : vector<8x128xf32>
    %c4 = arith.constant 4 : index
    %c0_29 = arith.constant 0 : index
    %c0_30 = arith.constant 0 : index
    %37 = vector.load %arg2[%c4, %c0_29, %c0_30] : memref<5x128x128xf32, #tpu.memory_space<vmem>>, vector<1x128x128xf32>
    %38 = vector.shape_cast %37 : vector<1x128x128xf32> to vector<128x128xf32>
    %cst_31 = arith.constant dense<0.000000e+00> : vector<8x128xf32>
    %39 = tpu.matmul %36, %38, %cst_31 {dimension_numbers = #tpu.dot_dimension_numbers<[1], [0], [0], [1], [0, 0, 1, 1], [], []>} : vector<8x128xf32>, vector<128x128xf32>, vector<8x128xf32> -> vector<8x128xf32>
    %c4_32 = arith.constant 4 : index
    %c0_33 = arith.constant 0 : index
    %c0_34 = arith.constant 0 : index
    %40 = vector.load %arg3[%c4_32, %c0_33, %c0_34] : memref<5x1x128xf32, #tpu.memory_space<vmem>>, vector<1x1x128xf32>
    %41 = vector.shape_cast %40 : vector<1x1x128xf32> to vector<1x128xf32>
    %42 = vector.broadcast %41 : vector<1x128xf32> to vector<8x128xf32>
    %43 = arith.addf %39, %42 : vector<8x128xf32>
    %c0_35 = arith.constant 0 : index
    %c0_36 = arith.constant 0 : index
    %44 = vector.load %arg4[%c0_35, %c0_36] : memref<8x128xf32, #tpu.memory_space<vmem>>, vector<8x128xf32>
    tpu.vector_store %arg4[%c0_35, %c0_36], %43 {strides = array<i32>} : memref<8x128xf32, #tpu.memory_space<vmem>>, vector<8x128xf32>,
    return
  }
  func.func @transform_0(%arg0: i32) -> (i32, i32) {
    %c0_i32 = arith.constant 0 : i32
    %c0_i32_0 = arith.constant 0 : i32
    return %arg0, %c0_i32 : i32, i32
  }
  func.func @transform_1(%arg0: i32) -> (i32, i32, i32) {
    %c0_i32 = arith.constant 0 : i32
    %c0_i32_0 = arith.constant 0 : i32
    %c0_i32_1 = arith.constant 0 : i32
    %c0_i32_2 = arith.constant 0 : i32
    return %c0_i32, %c0_i32_0, %c0_i32_1 : i32, i32, i32
  }
  func.func @transform_2(%arg0: i32) -> (i32, i32, i32) {
    %c0_i32 = arith.constant 0 : i32
    %c0_i32_0 = arith.constant 0 : i32
    %c0_i32_1 = arith.constant 0 : i32
    %c0_i32_2 = arith.constant 0 : i32
    return %c0_i32, %c0_i32_0, %c0_i32_1 : i32, i32, i32
  }
  func.func @transform_3(%arg0: i32) -> (i32, i32) {
    %c0_i32 = arith.constant 0 : i32
    %c0_i32_0 = arith.constant 0 : i32
    return %arg0, %c0_i32 : i32, i32
  }
}

</mosaic_0001>

<bundles_post_ra>
// kernel: tpu_custom_call.1
= control target key start
LH: loop header
LB: loop body
LE: loop exit
PB: predicated region body
PF: predicated region fallthrough
CT: control target
= control target key end

     0   :  { %8 = vsyncpa [#allocation3], 0  ;;  %s1141_s0 = inlined_call_operand.hbm [shape: f32[8,128], index: 0, kind: input, shape index: {}]   ;;  %s1142_s1 = inlined_call_operand.hbm [shape: f32[5,128,128], index: 1, kind: input, shape index: {}]   ;;  %s1143_s2 = inlined_call_operand.vmem [shape: f32[5,1,128], index: 2, kind: input, shape index: {}]   ;;  %s1144_s3 = inlined_call_operand.hbm [shape: f32[8,128], index: 3, kind: output, shape index: {}]  }
   0x1   :  { %9 = vsyncpa [#allocation6], 0 }
   0x2   :  { %10 = vsyncpa [#allocation4], 0  ;;  %s1005_s12 = smov [#allocation2]   ;;  %s1006_s14 = smov [#allocation5]  }
   0x3   :  { %s17_s13 = sshll.u32 %s1005_s12, 4  ;;  %s26_s15 = sshll.u32 %s1006_s14, 4  ;;  %s18_s13 = int_to_ptr.vmem [resolvable:$true] %s17_s13  ;;  %s1033_s15 = int_to_ptr.vmem [resolvable:$true] %s26_s15 }
   0x4   :  { %s933_s18 = scalar_lea.hbm %s1141_s0, 128 }
   0x5   :  { %p934_p0 = scmp.ne.s32.totalorder %s1141_s0, %s933_s18  ;;  %p937_p1 = scmp.lt.u32.totalorder %s933_s18, %s1141_s0 }
   0x7   :  { %p939_p2 = pnand %p937_p1, %p934_p0 }
   0x9   :  { %942 = shalt.err (!%p939_p2)
}
   0xa   :  { %s943_s23 = scalar_lea.vmem %s18_s13, 128  ;;  %p948_p4 = scmp.lt.s32.totalorder %s18_s13, %s18_s13 }
   0xb   :  { %p944_p3 = scmp.ne.s32.totalorder %s18_s13, %s943_s23  ;;  %p949_p5 = scmp.lt.s32.totalorder %s943_s23, %s943_s23 }
   0xd   :  { %p950_p6 = por %p949_p5, %p948_p4 }
   0xf   :  { %p951_p7 = pnand %p950_p6, %p944_p3 }
  0x11   :  { %954 = shalt.err (!%p951_p7)
}
  0x12   :  { %20 = dma.hbm_to_vmem [thread:$0]  %s1141_s0, 128, %s18_s13, [#allocation3]  }
  0x13   :  { %s955_s28 = scalar_lea.hbm %s1142_s1, 10240 }
  0x14   :  { %p956_p8 = scmp.ne.s32.totalorder %s1142_s1, %s955_s28  ;;  %p959_p9 = scmp.lt.u32.totalorder %s955_s28, %s1142_s1 }
  0x16   :  { %p961_p10 = pnand %p959_p9, %p956_p8 }
  0x18   :  { %964 = shalt.err (!%p961_p10)
}
  0x19   :  { %s965_s6 = scalar_lea.vmem %s1033_s15, 10240  ;;  %p970_p12 = scmp.lt.s32.totalorder %s1033_s15, %s1033_s15 }
  0x1a   :  { %p966_p11 = scmp.ne.s32.totalorder %s1033_s15, %s965_s6  ;;  %p971_p13 = scmp.lt.s32.totalorder %s965_s6, %s965_s6 }
  0x1c   :  { %p972_p0 = por %p971_p13, %p970_p12 }
  0x1e   :  { %p973_p1 = pnand %p972_p0, %p966_p11 }
  0x20   :  { %976 = shalt.err (!%p973_p1)
}
  0x21   :  { %s1007_s0 = smov 128   ;;  %s1008_s7 = smov 8  }
  0x22   :  { %32 = dma.hbm_to_vmem [thread:$0]  %s1142_s1, 10240, %s1033_s15, [#allocation6], %s1007_s0, %s1007_s0, %s1008_s7  }
  0x23   :  { %999 = dma.done.wait [#allocation3], 128  }
  0x24   :  { %1000 = vsyncadd [#allocation3], 4294967168 }
  0x25   :  { %1001 = dma.done.wait [#allocation6], 10240  }
  0x26   :  { %1002 = vsyncadd [#allocation6], 4294957056  ;;  %v1009_v0 = vmov 0.0|0.0   ;;  %vm1010_vm0 = vmmov 0   ;;  %v1011_v1 = vmov 0.0   ;;  %v42_v2 = vld [vmem:[#allocation5] sm:$0xff] }
  0x27   :  { %805 = vmatprep.subr.bf16.mxu0 %v1009_v0  ;;  %662 = vmatprep.mubr.msk.f32.mxu0 %vm1010_vm0, %v1011_v1  ;;  %v43_v3 = vld [vmem:[#allocation5 + $0x8] sm:$0xff]  ;;  %v44_v4 = vld [vmem:[#allocation5 + $0x10] sm:$0xff]  ;;  %v45_v6 = vld [vmem:[#allocation5 + $0x18] sm:$0xff]  ;;  %s1012_s19 = smov [#allocation7]  }
  0x28   :  { %829 = vmatprep.subr.bf16.mxu1 %v1009_v0  ;;  %697 = vmatprep.mubr.msk.f32.mxu1 %vm1010_vm0, %v1011_v1  ;;  %v806_v5 = vpack.c.bf16 %v43_v3, %v42_v2  ;;  %v809_v7 = vpack.c.bf16 %v45_v6, %v44_v4  ;;  %v46_v8 = vld [vmem:[#allocation5 + $0x20] sm:$0xff]  ;;  %v47_v9 = vld [vmem:[#allocation5 + $0x28] sm:$0xff]  ;;  %v139_v12 = vld [vmem:[#allocation5 + $0x90] sm:$0xff]  ;;  %s526_s20 = sshll.u32 %s1012_s19, 4  ;;  %s527_s20 = int_to_ptr.vmem [resolvable:$true] %s526_s20 }
  0x29   :  { %v137_v10 = vld [vmem:[#allocation5 + $0x80] sm:$0xff]  ;;  %v138_v11 = vld [vmem:[#allocation5 + $0x88] sm:$0xff]  ;;  %v140_v13 = vld [vmem:[#allocation5 + $0x98] sm:$0xff]  ;;  %v812_v14 = vpack.c.bf16 %v47_v9, %v46_v8  ;;  %s977_s21 = scalar_lea.vmem %s527_s20, 128  ;;  %p982_p3 = scmp.lt.s32.totalorder %s527_s20, %s527_s20 }
  0x2a   :  { %807 = vmatpush3.bf16.msra.mxu0 %v806_v5  ;;  %v830_v15 = vpack.c.bf16 %v138_v11, %v137_v10  ;;  %v48_v16 = vld [vmem:[#allocation5 + $0x30] sm:$0xff]  ;;  %v49_v17 = vld [vmem:[#allocation5 + $0x38] sm:$0xff]  ;;  %v833_v18 = vpack.c.bf16 %v140_v13, %v139_v12  ;;  %v141_v19 = vld [vmem:[#allocation5 + $0xa0] sm:$0xff]  ;;  %p978_p2 = scmp.ne.s32.totalorder %s527_s20, %s977_s21  ;;  %p983_p4 = scmp.lt.s32.totalorder %s977_s21, %s977_s21 }
  0x2b   :  { %808 = vmatprep.subr.bf16.mxu0 %v1009_v0  ;;  %v142_v20 = vld [vmem:[#allocation5 + $0xa8] sm:$0xff]  ;;  %v815_v21 = vpack.c.bf16 %v49_v17, %v48_v16  ;;  %v50_v22 = vld [vmem:[#allocation5 + $0x40] sm:$0xff]  ;;  %v143_v25 = vld [vmem:[#allocation5 + $0xb0] sm:$0xff] }
  0x2c   :  { %831 = vmatpush3.bf16.msra.mxu1 %v830_v15  ;;  %v51_v23 = vld [vmem:[#allocation5 + $0x48] sm:$0xff]  ;;  %v836_v24 = vpack.c.bf16 %v142_v20, %v141_v19  ;;  %v144_v26 = vld [vmem:[#allocation5 + $0xb8] sm:$0xff]  ;;  %v52_v28 = vld [vmem:[#allocation5 + $0x50] sm:$0xff]  ;;  %p984_p5 = por %p983_p4, %p982_p3 }
  0x2d   :  { %832 = vmatprep.subr.bf16.mxu1 %v1009_v0  ;;  %v818_v27 = vpack.c.bf16 %v51_v23, %v50_v22  ;;  %v53_v29 = vld [vmem:[#allocation5 + $0x58] sm:$0xff]  ;;  %v839_v30 = vpack.c.bf16 %v144_v26, %v143_v25  ;;  %v145_v31 = vld [vmem:[#allocation5 + $0xc0] sm:$0xff]  ;;  %v146_v32 = vld [vmem:[#allocation5 + $0xc8] sm:$0xff] }
  0x2e   :  { %810 = vmatpush3.bf16.msra.mxu0 %v809_v7  ;;  %v821_v33 = vpack.c.bf16 %v53_v29, %v52_v28  ;;  %v54_v34 = vld [vmem:[#allocation5 + $0x60] sm:$0xff]  ;;  %v55_v35 = vld [vmem:[#allocation5 + $0x68] sm:$0xff]  ;;  %v842_v36 = vpack.c.bf16 %v146_v32, %v145_v31  ;;  %v147_v37 = vld [vmem:[#allocation5 + $0xd0] sm:$0xff]  ;;  %p985_p6 = pnand %p984_p5, %p978_p2 }
  0x2f   :  { %811 = vmatprep.subr.bf16.mxu0 %v1009_v0  ;;  %v148_v38 = vld [vmem:[#allocation5 + $0xd8] sm:$0xff]  ;;  %v824_v39 = vpack.c.bf16 %v55_v35, %v54_v34  ;;  %v56_v40 = vld [vmem:[#allocation5 + $0x70] sm:$0xff]  ;;  %v149_v43 = vld [vmem:[#allocation5 + $0xe0] sm:$0xff] }
  0x30   :  { %834 = vmatpush3.bf16.msra.mxu1 %v833_v18  ;;  %v57_v41 = vld [vmem:[#allocation5 + $0x78] sm:$0xff]  ;;  %v845_v42 = vpack.c.bf16 %v148_v38, %v147_v37  ;;  %v150_v44 = vld [vmem:[#allocation5 + $0xe8] sm:$0xff]  ;;  %v151_v48 = vld [vmem:[#allocation5 + $0xf0] sm:$0xff] }
  0x31   :  { %835 = vmatprep.subr.bf16.mxu1 %v1009_v0  ;;  %v827_v45 = vpack.c.bf16 %v57_v41, %v56_v40  ;;  %v848_v46 = vpack.c.bf16 %v150_v44, %v149_v43  ;;  %v41_v47 = vld [vmem:[#allocation2] sm:$0xff]  ;;  %v233_v51 = vld [vmem:[#allocation5 + $0x100] sm:$0xff]  ;;  %v234_v52 = vld [vmem:[#allocation5 + $0x108] sm:$0xff] }
  0x32   :  { %813 = vmatpush3.bf16.msra.mxu0 %v812_v14  ;;  %v152_v49 = vld [vmem:[#allocation5 + $0xf8] sm:$0xff]  ;;  %v235_v53 = vld [vmem:[#allocation5 + $0x110] sm:$0xff]  ;;  %v854_v54 = vpack.c.bf16 %v234_v52, %v233_v51  ;;  %v237_v57 = vld [vmem:[#allocation5 + $0x120] sm:$0xff] }
  0x33   :  { %814 = vmatprep.subr.bf16.mxu0 %v1009_v0  ;;  %v851_v50 = vpack.c.bf16 %v152_v49, %v151_v48  ;;  %v236_v55 = vld [vmem:[#allocation5 + $0x118] sm:$0xff]  ;;  %v238_v58 = vld [vmem:[#allocation5 + $0x128] sm:$0xff]  ;;  %v239_v60 = vld [vmem:[#allocation5 + $0x130] sm:$0xff] }
  0x34   :  { %837 = vmatpush3.bf16.msra.mxu1 %v836_v24  ;;  %v857_v56 = vpack.c.bf16 %v236_v55, %v235_v53  ;;  %v860_v59 = vpack.c.bf16 %v238_v58, %v237_v57  ;;  %v240_v61 = vld [vmem:[#allocation5 + $0x138] sm:$0xff]  ;;  %v241_v63 = vld [vmem:[#allocation5 + $0x140] sm:$0xff]  ;;  %v242_v2 = vld [vmem:[#allocation5 + $0x148] sm:$0xff] }
  0x35   :  { %838 = vmatprep.subr.bf16.mxu1 %v1009_v0  ;;  %v863_v62 = vpack.c.bf16 %v240_v61, %v239_v60  ;;  %v866_v3 = vpack.c.bf16 %v242_v2, %v241_v63  ;;  %v243_v4 = vld [vmem:[#allocation5 + $0x150] sm:$0xff]  ;;  %v244_v5 = vld [vmem:[#allocation5 + $0x158] sm:$0xff]  ;;  %v245_v7 = vld [vmem:[#allocation5 + $0x160] sm:$0xff] }
  0x36   :  { %816 = vmatpush3.bf16.msra.mxu0 %v815_v21  ;;  %v869_v6 = vpack.c.bf16 %v244_v5, %v243_v4  ;;  %v246_v8 = vld [vmem:[#allocation5 + $0x168] sm:$0xff]  ;;  %v536_v10 = vld [vmem:[%s1143_s2] ss:$0 sm:$0xff]  ;;  %v247_v15 = vld [vmem:[#allocation5 + $0x170] sm:$0xff] }
  0x37   :  { %817 = vmatprep.subr.bf16.mxu0 %v1009_v0  ;;  %v872_v9 = vpack.c.bf16 %v246_v8, %v245_v7  ;;  %v248_v16 = vld [vmem:[#allocation5 + $0x178] sm:$0xff]  ;;  %v329_v18 = vld [vmem:[#allocation5 + $0x180] sm:$0xff]  ;;  %v330_v19 = vld [vmem:[#allocation5 + $0x188] sm:$0xff] }
  0x38   :  { %840 = vmatpush3.bf16.msra.mxu1 %v839_v30  ;;  %v875_v17 = vpack.c.bf16 %v248_v16, %v247_v15  ;;  %v331_v20 = vld [vmem:[#allocation5 + $0x190] sm:$0xff]  ;;  %v878_v21 = vpack.c.bf16 %v330_v19, %v329_v18  ;;  %v332_v22 = vld [vmem:[#allocation5 + $0x198] sm:$0xff]  ;;  %v333_v24 = vld [vmem:[#allocation5 + $0x1a0] sm:$0xff] }
  0x39   :  { %841 = vmatprep.subr.bf16.mxu1 %v1009_v0  ;;  %v881_v23 = vpack.c.bf16 %v332_v22, %v331_v20  ;;  %v334_v25 = vld [vmem:[#allocation5 + $0x1a8] sm:$0xff]  ;;  %v336_v28 = vld [vmem:[#allocation5 + $0x1b8] sm:$0xff]  ;;  %v337_v30 = vld [vmem:[#allocation5 + $0x1c0] sm:$0xff] }
  0x3a   :  { %819 = vmatpush3.bf16.msra.mxu0 %v818_v27  ;;  %v884_v26 = vpack.c.bf16 %v334_v25, %v333_v24  ;;  %v335_v27 = vld [vmem:[#allocation5 + $0x1b0] sm:$0xff]  ;;  %v338_v31 = vld [vmem:[#allocation5 + $0x1c8] sm:$0xff]  ;;  %v340_v34 = vld [vmem:[#allocation5 + $0x1d8] sm:$0xff] }
  0x3b   :  { %820 = vmatprep.subr.bf16.mxu0 %v1009_v0  ;;  %v887_v29 = vpack.c.bf16 %v336_v28, %v335_v27  ;;  %v890_v32 = vpack.c.bf16 %v338_v31, %v337_v30  ;;  %v342_v37 = vld [vmem:[#allocation5 + $0x1e8] sm:$0xff]  ;;  %v343_v44 = vld [vmem:[#allocation5 + $0x1f0] sm:$0xff]  ;;  %v428_v51 = vld [vmem:[#allocation5 + $0x218] sm:$0xff] }
  0x3c   :  { %843 = vmatpush3.bf16.msra.mxu1 %v842_v36  ;;  %v341_v36 = vld [vmem:[#allocation5 + $0x1e0] sm:$0xff]  ;;  %v426_v48 = vld [vmem:[#allocation5 + $0x208] sm:$0xff]  ;;  %v427_v49 = vld [vmem:[#allocation5 + $0x210] sm:$0xff] }
  0x3d   :  { %844 = vmatprep.subr.bf16.mxu1 %v1009_v0  ;;  %v896_v38 = vpack.c.bf16 %v342_v37, %v341_v36  ;;  %v905_v52 = vpack.c.bf16 %v428_v51, %v427_v49  ;;  %v429_v53 = vld [vmem:[#allocation5 + $0x220] sm:$0xff]  ;;  %v435_v61 = vld [vmem:[#allocation5 + $0x250] sm:$0xff]  ;;  %v540_v5 = vld [vmem:[%s1143_s2 + $0x2] ss:$0 sm:$0xff] }
  0x3e   :  { %822 = vmatpush3.bf16.msra.mxu0 %v821_v33  ;;  %v339_v33 = vld [vmem:[#allocation5 + $0x1d0] sm:$0xff]  ;;  %v433_v58 = vld [vmem:[#allocation5 + $0x240] sm:$0xff] }
  0x3f   :  { %823 = vmatprep.subr.bf16.mxu0 %v1009_v0  ;;  %v893_v35 = vpack.c.bf16 %v340_v34, %v339_v33  ;;  %v437_v2 = vld [vmem:[#allocation5 + $0x260] sm:$0xff] }
  0x40   :  { %846 = vmatpush3.bf16.msra.mxu1 %v845_v42 }
  0x41   :  { %847 = vmatprep.subr.bf16.mxu1 %v1009_v0 }
  0x42   :  { %825 = vmatpush3.bf16.msra.mxu0 %v824_v39  ;;  %v538_v39 = vld [vmem:[%s1143_s2 + $0x1] ss:$0 sm:$0xff] }
  0x43   :  { %826 = vmatprep.subr.bf16.mxu0 %v1009_v0 }
  0x44   :  { %849 = vmatpush3.bf16.msra.mxu1 %v848_v46 }
  0x45   :  { %850 = vmatprep.subr.bf16.mxu1 %v1009_v0 }
  0x46   :  { %828 = vmatpush3.bf16.msra.mxu0 %v827_v45  ;;  %v344_v45 = vld [vmem:[#allocation5 + $0x1f8] sm:$0xff] }
  0x47   :  { %853 = vmatprep.subr.bf16.mxu0 %v1009_v0  ;;  %v899_v46 = vpack.c.bf16 %v344_v45, %v343_v44 }
  0x48   :  { %852 = vmatpush3.bf16.msra.mxu1 %v851_v50 }
  0x49   :  { %663 = vmatmul.mubr.f32.vlgmr.msra.gmra.mrb[0].mxu0 %v41_v47  ;;  %877 = vmatprep.subr.bf16.mxu1 %v1009_v0  ;;  %v425_v47 = vld [vmem:[#allocation5 + $0x200] sm:$0xff] }
  0x4a   :  { %732 = vmatprep.mubr.msk.f32.mxu0 %vm1010_vm0, %v1011_v1  ;;  %855 = vmatpush3.bf16.msra.mxu0 %v854_v54  ;;  %v902_v50 = vpack.c.bf16 %v426_v48, %v425_v47  ;;  %v430_v54 = vld [vmem:[#allocation5 + $0x228] sm:$0xff] }
  0x4b   :  { %856 = vmatprep.subr.bf16.mxu0 %v1009_v0  ;;  %v908_v55 = vpack.c.bf16 %v430_v54, %v429_v53 }
  0x4e   :  { %858 = vmatpush3.bf16.msra.mxu0 %v857_v56  ;;  %v432_v56 = vld [vmem:[#allocation5 + $0x238] sm:$0xff] }
  0x4f   :  { %859 = vmatprep.subr.bf16.mxu0 %v1009_v0 }
  0x52   :  { %861 = vmatpush3.bf16.msra.mxu0 %v860_v59  ;;  %v434_v59 = vld [vmem:[#allocation5 + $0x248] sm:$0xff] }
  0x53   :  { %862 = vmatprep.subr.bf16.mxu0 %v1009_v0  ;;  %v914_v60 = vpack.c.bf16 %v434_v59, %v433_v58 }
  0x56   :  { %864 = vmatpush3.bf16.msra.mxu0 %v863_v62  ;;  %v436_v62 = vld [vmem:[#allocation5 + $0x258] sm:$0xff] }
  0x57   :  { %865 = vmatprep.subr.bf16.mxu0 %v1009_v0  ;;  %v917_v63 = vpack.c.bf16 %v436_v62, %v435_v61 }
  0x5a   :  { %867 = vmatpush3.bf16.msra.mxu0 %v866_v3  ;;  %v438_v3 = vld [vmem:[#allocation5 + $0x268] sm:$0xff] }
  0x5b   :  { %868 = vmatprep.subr.bf16.mxu0 %v1009_v0  ;;  %v920_v4 = vpack.c.bf16 %v438_v3, %v437_v2 }
  0x5e   :  { %870 = vmatpush3.bf16.msra.mxu0 %v869_v6 }
  0x5f   :  { %871 = vmatprep.subr.bf16.mxu0 %v1009_v0 }
  0x62   :  { %873 = vmatpush3.bf16.msra.mxu0 %v872_v9 }
  0x63   :  { %874 = vmatprep.subr.bf16.mxu0 %v1009_v0 }
  0x66   :  { %876 = vmatpush3.bf16.msra.mxu0 %v875_v17  ;;  %v544_v17 = vld [vmem:[%s1143_s2 + $0x4] ss:$0 sm:$0xff] }
  0x67   :  { %901 = vmatprep.subr.bf16.mxu0 %v1009_v0 }
 0x11c   :  { %v131_v11 = vpop.f32.mrb[0].mxu0 }
 0x11d   :  { %v132_v12 = vadd.f32 %v536_v10, %v131_v11  ;;  %v664_v13 = vpop.f32.mrb[1].mxu0  ;;  %v439_v10 = vld [vmem:[#allocation5 + $0x270] sm:$0xff]  ;;  %v440_v11 = vld [vmem:[#allocation5 + $0x278] sm:$0xff] }
 0x11e   :  { %v542_v13 = vld [vmem:[%s1143_s2 + $0x3] ss:$0 sm:$0xff] }
 0x11f   :  { %v135_v14 = vmax.f32 %v132_v12, 0.0  ;;  %v923_v12 = vpack.c.bf16 %v440_v11, %v439_v10 }
 0x121   :  { %698 = vmatmul.mubr.f32.vlgmr.msra.gmra.mrb[0].mxu1 %v135_v14 }
 0x122   :  { %767 = vmatprep.mubr.msk.f32.mxu1 %vm1010_vm0, %v1011_v1  ;;  %879 = vmatpush3.bf16.msra.mxu1 %v878_v21 }
 0x123   :  { %880 = vmatprep.subr.bf16.mxu1 %v1009_v0 }
 0x126   :  { %882 = vmatpush3.bf16.msra.mxu1 %v881_v23 }
 0x127   :  { %883 = vmatprep.subr.bf16.mxu1 %v1009_v0 }
 0x12a   :  { %885 = vmatpush3.bf16.msra.mxu1 %v884_v26 }
 0x12b   :  { %886 = vmatprep.subr.bf16.mxu1 %v1009_v0 }
 0x12e   :  { %888 = vmatpush3.bf16.msra.mxu1 %v887_v29 }
 0x12f   :  { %889 = vmatprep.subr.bf16.mxu1 %v1009_v0 }
 0x132   :  { %891 = vmatpush3.bf16.msra.mxu1 %v890_v32 }
 0x133   :  { %892 = vmatprep.subr.bf16.mxu1 %v1009_v0 }
 0x136   :  { %894 = vmatpush3.bf16.msra.mxu1 %v893_v35 }
 0x137   :  { %895 = vmatprep.subr.bf16.mxu1 %v1009_v0 }
 0x13a   :  { %897 = vmatpush3.bf16.msra.mxu1 %v896_v38 }
 0x13b   :  { %898 = vmatprep.subr.bf16.mxu1 %v1009_v0 }
 0x13e   :  { %900 = vmatpush3.bf16.msra.mxu1 %v899_v46 }
 0x1f4   :  { %v227_v40 = vpop.f32.mrb[0].mxu1 }
 0x1f5   :  { %v228_v41 = vadd.f32 %v538_v39, %v227_v40  ;;  %v699_v42 = vpop.f32.mrb[1].mxu1 }
 0x1f7   :  { %v231_v43 = vmax.f32 %v228_v41, 0.0 }
 0x1f9   :  { %733 = vmatmul.mubr.f32.vlgmr.msra.gmra.mrb[2].mxu0 %v231_v43 }
 0x1fa   :  { %802 = vmatprep.mubr.msk.f32.mxu0 %vm1010_vm0, %v1011_v1  ;;  %903 = vmatpush3.bf16.msra.mxu0 %v902_v50  ;;  %v431_v1 = vld [vmem:[#allocation5 + $0x230] sm:$0xff] }
 0x1fb   :  { %904 = vmatprep.subr.bf16.mxu0 %v1009_v0  ;;  %v911_v57 = vpack.c.bf16 %v432_v56, %v431_v1 }
 0x1fe   :  { %906 = vmatpush3.bf16.msra.mxu0 %v905_v52 }
 0x1ff   :  { %907 = vmatprep.subr.bf16.mxu0 %v1009_v0 }
 0x202   :  { %909 = vmatpush3.bf16.msra.mxu0 %v908_v55 }
 0x203   :  { %910 = vmatprep.subr.bf16.mxu0 %v1009_v0 }
 0x206   :  { %912 = vmatpush3.bf16.msra.mxu0 %v911_v57 }
 0x207   :  { %913 = vmatprep.subr.bf16.mxu0 %v1009_v0 }
 0x20a   :  { %915 = vmatpush3.bf16.msra.mxu0 %v914_v60 }
 0x20b   :  { %916 = vmatprep.subr.bf16.mxu0 %v1009_v0 }
 0x20e   :  { %918 = vmatpush3.bf16.msra.mxu0 %v917_v63 }
 0x20f   :  { %919 = vmatprep.subr.bf16.mxu0 %v1009_v0 }
 0x212   :  { %921 = vmatpush3.bf16.msra.mxu0 %v920_v4 }
 0x213   :  { %922 = vmatprep.subr.bf16.mxu0 %v1009_v0 }
 0x216   :  { %924 = vmatpush3.bf16.msra.mxu0 %v923_v12 }
 0x2cc   :  { %v323_v6 = vpop.f32.mrb[2].mxu0 }
 0x2cd   :  { %v324_v7 = vadd.f32 %v540_v5, %v323_v6  ;;  %v734_v8 = vpop.f32.mrb[3].mxu0 }
 0x2cf   :  { %v327_v9 = vmax.f32 %v324_v7, 0.0 }
 0x2d1   :  { %768 = vmatmul.mubr.f32.vlgmr.msra.gmra.mrb[2].mxu1 %v327_v9 }
 0x3a4   :  { %v419_v14 = vpop.f32.mrb[2].mxu1 }
 0x3a5   :  { %v420_v15 = vadd.f32 %v542_v13, %v419_v14  ;;  %v769_v0 = vpop.f32.mrb[3].mxu1 }
 0x3a7   :  { %v423_v16 = vmax.f32 %v420_v15, 0.0 }
 0x3a9   :  { %803 = vmatmul.mubr.f32.vlgmr.msra.gmra.mrb[4].mxu0 %v423_v16 }
 0x47c   :  { %v515_v18 = vpop.f32.mrb[4].mxu0 }
 0x47d   :  { %v516_v19 = vadd.f32 %v544_v17, %v515_v18  ;;  %v804_v20 = vpop.f32.mrb[5].mxu0 }
 0x47f   :  { %519 = vst [vmem:[#allocation7] sm:$0xff] %v516_v19 }
 0x480   :  { %988 = shalt.err (!%p985_p6)
}
 0x481   :  { %s989_s24 = scalar_lea.hbm %s1144_s3, 128 }
 0x482   :  { %p990_p7 = scmp.ne.s32.totalorder %s1144_s3, %s989_s24  ;;  %p993_p8 = scmp.lt.u32.totalorder %s989_s24, %s1144_s3 }
 0x484   :  { %p995_p9 = pnand %p993_p8, %p990_p7 }
 0x486   :  { %998 = shalt.err (!%p995_p9)
}
 0x487   :  { %529 = dma.vmem_to_hbm [thread:$0]  %s527_s20, 128, %s1144_s3, [#allocation4]  }
 0x488   :  { %1003 = dma.done.wait [#allocation4], 128  }
 0x489   :  { %1004 = vsyncadd [#allocation4], 4294967168 }
 0x48a   :  { %533 = vsyncpa [#allocation3], 1 }
 0x48b   :  { %534 = vsyncpa [#allocation6], 1 }
 0x48c   :  { %535 = vsyncpa [#allocation4], 1 }

</bundles_post_ra>
